<compile_context>
chip_gen: v6e
topology: v6e:2x2x1
jax: 0.10.0
libtpu: 0.0.40
codegen_flags: <defaults>
</compile_context>

<pallas_src>
import functools

import jax
import jax.numpy as jnp
from jax.experimental import pallas as pl
from jax.experimental.pallas import tpu as pltpu

LANES = 128        # vreg lane width
MAX_ROWS = 256     # sublane rows per tile -> 256*128 = 32768 boxes per grid step
ROW_ALIGN = 32     # keep the sublane block a multiple of 32 (safe for f32/bf16/i8 tiling)


def _choose_rows(nb: int) -> int:
    """Rows (of 128 boxes) per grid step."""
    if nb >= MAX_ROWS:
        return MAX_ROWS
    return max(ROW_ALIGN, ((nb + ROW_ALIGN - 1) // ROW_ALIGN) * ROW_ALIGN)


def _giou_kernel(pred_ref, tgt_ref, w_ref, loss_ref, *, eps):
    # pred_ref / tgt_ref: (4, R, 128) in native dtype
    # w_ref / loss_ref:   (R, 128) float32
    px1 = pred_ref[0].astype(jnp.float32)
    py1 = pred_ref[1].astype(jnp.float32)
    px2 = pred_ref[2].astype(jnp.float32)
    py2 = pred_ref[3].astype(jnp.float32)
    tx1 = tgt_ref[0].astype(jnp.float32)
    ty1 = tgt_ref[1].astype(jnp.float32)
    tx2 = tgt_ref[2].astype(jnp.float32)
    ty2 = tgt_ref[3].astype(jnp.float32)
    w = w_ref[...].astype(jnp.float32)

    area_p = (px2 - px1) * (py2 - py1)
    area_t = (tx2 - tx1) * (ty2 - ty1)

    # intersection
    iw = jnp.maximum(jnp.minimum(px2, tx2) - jnp.maximum(px1, tx1), 0.0)
    ih = jnp.maximum(jnp.minimum(py2, ty2) - jnp.maximum(py1, ty1), 0.0)
    overlap = iw * ih

    union = jnp.maximum(area_p + area_t - overlap, eps)
    ious = overlap / union

    # smallest enclosing box
    ew = jnp.maximum(jnp.maximum(px2, tx2) - jnp.minimum(px1, tx1), 0.0)
    eh = jnp.maximum(jnp.maximum(py2, ty2) - jnp.minimum(py1, ty1), 0.0)
    enclose = jnp.maximum(ew * eh, eps)

    gious = ious - (enclose - union) / enclose
    # weight also zeroes padded lanes
    loss_ref[...] = ((1.0 - gious) * w).astype(loss_ref.dtype)


def _giou_pallas(pred_t, tgt_t, w_t, rows, eps):
    """pred_t / tgt_t: (4, NB, 128) native dtype; w_t: (NB, 128) f32 (pad lanes = 0)."""
    nb_pad = pred_t.shape[1]
    grid = (nb_pad // rows,)
    n_boxes = nb_pad * LANES

    bytes_in = (pred_t.size * pred_t.dtype.itemsize
                + tgt_t.size * tgt_t.dtype.itemsize
                + w_t.size * w_t.dtype.itemsize)
    bytes_out = n_boxes * 4
    cost = pl.CostEstimate(flops=30 * n_boxes, transcendentals=0,
                           bytes_accessed=bytes_in + bytes_out)

    kernel = functools.partial(_giou_kernel, eps=eps)
    return pl.pallas_call(
        kernel,
        out_shape=jax.ShapeDtypeStruct((nb_pad, LANES), jnp.float32),
        grid=grid,
        in_specs=[
            pl.BlockSpec((4, rows, LANES), lambda i: (0, i, 0)),
            pl.BlockSpec((4, rows, LANES), lambda i: (0, i, 0)),
            pl.BlockSpec((rows, LANES), lambda i: (i, 0)),
        ],
        out_specs=pl.BlockSpec((rows, LANES), lambda i: (i, 0)),
        compiler_params=pltpu.CompilerParams(
            dimension_semantics=("parallel",)),
        cost_estimate=cost,
    )(pred_t, tgt_t, w_t)


class GIoULoss:
    """JAX/Pallas port of the PyTorch GIoULoss module (forward only)."""

    def __init__(self, eps: float = 1e-6, reduction: str = "mean",
                 loss_weight: float = 1.0):
        self.eps = float(eps)
        self.reduction = reduction
        self.loss_weight = float(loss_weight)

    def __call__(self, pred, target, weight=None, avg_factor=None,
                 reduction_override=None):
        # TODO(synk): the torch branch `if weight is not None and not any(weight>0):
        #   return (pred*weight).sum()` is a data-dependent early-exit; the value it
        #   produces here is 0 either way, so it is not special-cased (forward only).
        reduction = reduction_override if reduction_override else self.reduction
        in_dtype = pred.dtype
        n = pred.shape[0]

        if weight is not None:
            w = weight.astype(jnp.float32)
            if w.ndim > 1:
                w = w.mean(axis=-1)
        else:
            w = jnp.ones((n,), jnp.float32)

        # pad the box count to rows*128 and build the lane-dense (4, NB, 128) layout.
        nb = max(1, -(-n // LANES))
        rows = _choose_rows(nb)
        nb_pad = -(-nb // rows) * rows
        n_pad = nb_pad * LANES
        pad = n_pad - n

        # NOTE: pred/target stay in their native dtype (bf16/f16 halves HBM traffic);
        # the kernel casts to f32 internally.  The transpose is the one remaining
        # wrapper-side pass over the data (required by the (n, 4) input contract).
        pred_t = jnp.pad(pred, ((0, pad), (0, 0))).T.reshape(4, nb_pad, LANES)
        tgt_t = jnp.pad(target, ((0, pad), (0, 0))).T.reshape(4, nb_pad, LANES)
        w_t = jnp.pad(w, (0, pad)).reshape(nb_pad, LANES)   # pad lanes get weight 0

        loss2d = _giou_pallas(pred_t, tgt_t, w_t, rows, self.eps)   # (NB, 128) f32

        if reduction == "none":
            out = loss2d.reshape(n_pad)[:n]
        elif reduction == "sum":
            out = jnp.sum(loss2d)
        elif reduction == "mean":
            denom = jnp.float32(n) if avg_factor is None else jnp.float32(avg_factor)
            out = jnp.sum(loss2d) / denom
        else:
            raise ValueError(f"unknown reduction: {reduction}")

        return (self.loss_weight * out).astype(in_dtype)


def _giou_loss_ref(pred, target, eps):
    """Pure-JAX reference for validation."""
    px1, py1, px2, py2 = [pred[:, i] for i in range(4)]
    tx1, ty1, tx2, ty2 = [target[:, i] for i in range(4)]
    area_p = (px2 - px1) * (py2 - py1)
    area_t = (tx2 - tx1) * (ty2 - ty1)
    iw = jnp.clip(jnp.minimum(px2, tx2) - jnp.maximum(px1, tx1), 0)
    ih = jnp.clip(jnp.minimum(py2, ty2) - jnp.maximum(py1, ty1), 0)
    overlap = iw * ih
    union = jnp.maximum(area_p + area_t - overlap, eps)
    ious = overlap / union
    ew = jnp.clip(jnp.maximum(px2, tx2) - jnp.minimum(px1, tx1), 0)
    eh = jnp.clip(jnp.maximum(py2, ty2) - jnp.minimum(py1, ty1), 0)
    enclose = jnp.maximum(ew * eh, eps)
    gious = ious - (enclose - union) / enclose
    return 1.0 - gious


if __name__ == "__main__":
    key = jax.random.PRNGKey(0)

    def make_boxes(k, n):
        k1, k2 = jax.random.split(k)
        xy = jax.random.uniform(k1, (n, 2), jnp.float32, 0.0, 32.0)
        wh = jax.random.uniform(k2, (n, 2), jnp.float32, 1.0, 16.0)
        return jnp.concatenate([xy, xy + wh], axis=1)   # (n, 4) well-formed boxes

    loss_mod = GIoULoss(eps=1e-6, reduction="mean", loss_weight=1.0)

    # --- small case (n=200, exercises padding) ---
    k1, k2, k3, key = jax.random.split(key, 4)
    n = 200
    pred = make_boxes(k1, n)
    target = make_boxes(k2, n)
    weight = jax.random.uniform(k3, (n,), jnp.float32, 0.0, 1.0)

    out_mean = jax.block_until_ready(loss_mod(pred, target, weight=weight))
    out_sum = jax.block_until_ready(
        loss_mod(pred, target, weight=weight, reduction_override="sum"))
    out_none = jax.block_until_ready(
        loss_mod(pred, target, reduction_override="none"))

    ref_per_box = _giou_loss_ref(pred, target, 1e-6)
    assert jnp.allclose(out_mean, jnp.mean(ref_per_box * weight), rtol=1e-5, atol=1e-5)
    assert jnp.allclose(out_sum, jnp.sum(ref_per_box * weight), rtol=1e-5, atol=1e-5)
    assert jnp.allclose(out_none, ref_per_box, rtol=1e-5, atol=1e-5)

    # --- bf16 inputs (no wrapper pre-cast; kernel does f32 math) ---
    pred_bf = pred.astype(jnp.bfloat16)
    tgt_bf = target.astype(jnp.bfloat16)
    out_bf = jax.block_until_ready(loss_mod(pred_bf, tgt_bf, weight=weight))
    ref_bf = jnp.mean(_giou_loss_ref(pred_bf.astype(jnp.float32),
                                     tgt_bf.astype(jnp.float32), 1e-6) * weight)
    assert jnp.allclose(out_bf.astype(jnp.float32), ref_bf, rtol=1e-2, atol=1e-2)

    # --- multi-tile case (grid > 1: 40000 boxes -> 2 grid steps of 256x128) ---
    k1, k2, key = jax.random.split(key, 3)
    n2 = 40000
    pred2 = make_boxes(k1, n2)
    target2 = make_boxes(k2, n2)
    out2 = jax.block_until_ready(loss_mod(pred2, target2))
    ref2 = jnp.mean(_giou_loss_ref(pred2, target2, 1e-6))
    assert jnp.allclose(out2, ref2, rtol=1e-5, atol=1e-5)

    print("KERNEL_OK")
</pallas_src>

<mosaic_0001>
module attributes {stable_mosaic.version = 11 : i64} {
  func.func @_giou_kernel(%arg0: i32, %arg1: memref<4x32x128xf32, #tpu.memory_space<vmem>>, %arg2: memref<4x32x128xf32, #tpu.memory_space<vmem>>, %arg3: memref<32x128xf32, #tpu.memory_space<vmem>>, %arg4: memref<32x128xf32, #tpu.memory_space<vmem>>) attributes {dimension_semantics = [#tpu.dimension_semantics<parallel>], iteration_bounds = array<i64: 1>, scalar_prefetch = 0 : i64, scratch_operands = 0 : i64, tpu.core_type = #tpu.core_type<tc>, window_params = [{transform_indices = @transform_0, window_bounds = array<i64: 4, 32, 128>}, {transform_indices = @transform_1, window_bounds = array<i64: 4, 32, 128>}, {transform_indices = @transform_2, window_bounds = array<i64: 32, 128>}, {transform_indices = @transform_3, window_bounds = array<i64: 32, 128>}]} {
    %c0 = arith.constant 0 : index
    %c0_0 = arith.constant 0 : index
    %c0_1 = arith.constant 0 : index
    %0 = vector.load %arg1[%c0, %c0_0, %c0_1] : memref<4x32x128xf32, #tpu.memory_space<vmem>>, vector<1x32x128xf32>
    %1 = vector.shape_cast %0 : vector<1x32x128xf32> to vector<32x128xf32>
    %c1 = arith.constant 1 : index
    %c0_2 = arith.constant 0 : index
    %c0_3 = arith.constant 0 : index
    %2 = vector.load %arg1[%c1, %c0_2, %c0_3] : memref<4x32x128xf32, #tpu.memory_space<vmem>>, vector<1x32x128xf32>
    %3 = vector.shape_cast %2 : vector<1x32x128xf32> to vector<32x128xf32>
    %c2 = arith.constant 2 : index
    %c0_4 = arith.constant 0 : index
    %c0_5 = arith.constant 0 : index
    %4 = vector.load %arg1[%c2, %c0_4, %c0_5] : memref<4x32x128xf32, #tpu.memory_space<vmem>>, vector<1x32x128xf32>
    %5 = vector.shape_cast %4 : vector<1x32x128xf32> to vector<32x128xf32>
    %c3 = arith.constant 3 : index
    %c0_6 = arith.constant 0 : index
    %c0_7 = arith.constant 0 : index
    %6 = vector.load %arg1[%c3, %c0_6, %c0_7] : memref<4x32x128xf32, #tpu.memory_space<vmem>>, vector<1x32x128xf32>
    %7 = vector.shape_cast %6 : vector<1x32x128xf32> to vector<32x128xf32>
    %c0_8 = arith.constant 0 : index
    %c0_9 = arith.constant 0 : index
    %c0_10 = arith.constant 0 : index
    %8 = vector.load %arg2[%c0_8, %c0_9, %c0_10] : memref<4x32x128xf32, #tpu.memory_space<vmem>>, vector<1x32x128xf32>
    %9 = vector.shape_cast %8 : vector<1x32x128xf32> to vector<32x128xf32>
    %c1_11 = arith.constant 1 : index
    %c0_12 = arith.constant 0 : index
    %c0_13 = arith.constant 0 : index
    %10 = vector.load %arg2[%c1_11, %c0_12, %c0_13] : memref<4x32x128xf32, #tpu.memory_space<vmem>>, vector<1x32x128xf32>
    %11 = vector.shape_cast %10 : vector<1x32x128xf32> to vector<32x128xf32>
    %c2_14 = arith.constant 2 : index
    %c0_15 = arith.constant 0 : index
    %c0_16 = arith.constant 0 : index
    %12 = vector.load %arg2[%c2_14, %c0_15, %c0_16] : memref<4x32x128xf32, #tpu.memory_space<vmem>>, vector<1x32x128xf32>
    %13 = vector.shape_cast %12 : vector<1x32x128xf32> to vector<32x128xf32>
    %c3_17 = arith.constant 3 : index
    %c0_18 = arith.constant 0 : index
    %c0_19 = arith.constant 0 : index
    %14 = vector.load %arg2[%c3_17, %c0_18, %c0_19] : memref<4x32x128xf32, #tpu.memory_space<vmem>>, vector<1x32x128xf32>
    %15 = vector.shape_cast %14 : vector<1x32x128xf32> to vector<32x128xf32>
    %c0_20 = arith.constant 0 : index
    %c0_21 = arith.constant 0 : index
    %16 = vector.load %arg3[%c0_20, %c0_21] : memref<32x128xf32, #tpu.memory_space<vmem>>, vector<32x128xf32>
    %17 = arith.subf %5, %1 : vector<32x128xf32>
    %18 = arith.subf %7, %3 : vector<32x128xf32>
    %19 = arith.mulf %17, %18 : vector<32x128xf32>
    %20 = arith.subf %13, %9 : vector<32x128xf32>
    %21 = arith.subf %15, %11 : vector<32x128xf32>
    %22 = arith.mulf %20, %21 : vector<32x128xf32>
    %23 = arith.minimumf %5, %13 : vector<32x128xf32>
    %24 = arith.maximumf %1, %9 : vector<32x128xf32>
    %25 = arith.subf %23, %24 : vector<32x128xf32>
    %cst = arith.constant 0.000000e+00 : f32
    %26 = vector.broadcast %cst : f32 to vector<32x128xf32>
    %27 = arith.maximumf %25, %26 : vector<32x128xf32>
    %28 = arith.minimumf %7, %15 : vector<32x128xf32>
    %29 = arith.maximumf %3, %11 : vector<32x128xf32>
    %30 = arith.subf %28, %29 : vector<32x128xf32>
    %cst_22 = arith.constant 0.000000e+00 : f32
    %31 = vector.broadcast %cst_22 : f32 to vector<32x128xf32>
    %32 = arith.maximumf %30, %31 : vector<32x128xf32>
    %33 = arith.mulf %27, %32 : vector<32x128xf32>
    %34 = arith.addf %19, %22 : vector<32x128xf32>
    %35 = arith.subf %34, %33 : vector<32x128xf32>
    %cst_23 = arith.constant 9.99999997E-7 : f32
    %36 = vector.broadcast %cst_23 : f32 to vector<32x128xf32>
    %37 = arith.maximumf %35, %36 : vector<32x128xf32>
    %38 = arith.divf %33, %37 : vector<32x128xf32>
    %39 = arith.maximumf %5, %13 : vector<32x128xf32>
    %40 = arith.minimumf %1, %9 : vector<32x128xf32>
    %41 = arith.subf %39, %40 : vector<32x128xf32>
    %cst_24 = arith.constant 0.000000e+00 : f32
    %42 = vector.broadcast %cst_24 : f32 to vector<32x128xf32>
    %43 = arith.maximumf %41, %42 : vector<32x128xf32>
    %44 = arith.maximumf %7, %15 : vector<32x128xf32>
    %45 = arith.minimumf %3, %11 : vector<32x128xf32>
    %46 = arith.subf %44, %45 : vector<32x128xf32>
    %cst_25 = arith.constant 0.000000e+00 : f32
    %47 = vector.broadcast %cst_25 : f32 to vector<32x128xf32>
    %48 = arith.maximumf %46, %47 : vector<32x128xf32>
    %49 = arith.mulf %43, %48 : vector<32x128xf32>
    %cst_26 = arith.constant 9.99999997E-7 : f32
    %50 = vector.broadcast %cst_26 : f32 to vector<32x128xf32>
    %51 = arith.maximumf %49, %50 : vector<32x128xf32>
    %52 = arith.subf %51, %37 : vector<32x128xf32>
    %53 = arith.divf %52, %51 : vector<32x128xf32>
    %54 = arith.subf %38, %53 : vector<32x128xf32>
    %cst_27 = arith.constant 1.000000e+00 : f32
    %55 = vector.broadcast %cst_27 : f32 to vector<32x128xf32>
    %56 = arith.subf %55, %54 : vector<32x128xf32>
    %57 = arith.mulf %56, %16 : vector<32x128xf32>
    %c0_28 = arith.constant 0 : index
    %c0_29 = arith.constant 0 : index
    %58 = vector.load %arg4[%c0_28, %c0_29] : memref<32x128xf32, #tpu.memory_space<vmem>>, vector<32x128xf32>
    tpu.vector_store %arg4[%c0_28, %c0_29], %57 {strides = array<i32>} : memref<32x128xf32, #tpu.memory_space<vmem>>, vector<32x128xf32>,
    return
  }
  func.func @transform_0(%arg0: i32) -> (i32, i32, i32) {
    %c0_i32 = arith.constant 0 : i32
    %c0_i32_0 = arith.constant 0 : i32
    %c0_i32_1 = arith.constant 0 : i32
    return %c0_i32, %arg0, %c0_i32_0 : i32, i32, i32
  }
  func.func @transform_1(%arg0: i32) -> (i32, i32, i32) {
    %c0_i32 = arith.constant 0 : i32
    %c0_i32_0 = arith.constant 0 : i32
    %c0_i32_1 = arith.constant 0 : i32
    return %c0_i32, %arg0, %c0_i32_0 : i32, i32, i32
  }
  func.func @transform_2(%arg0: i32) -> (i32, i32) {
    %c0_i32 = arith.constant 0 : i32
    %c0_i32_0 = arith.constant 0 : i32
    return %arg0, %c0_i32 : i32, i32
  }
  func.func @transform_3(%arg0: i32) -> (i32, i32) {
    %c0_i32 = arith.constant 0 : i32
    %c0_i32_0 = arith.constant 0 : i32
    return %arg0, %c0_i32 : i32, i32
  }
}

</mosaic_0001>

<bundles_post_ra>
// kernel: tpu_custom_call.1
= control target key start
LH: loop header
LB: loop body
LE: loop exit
PB: predicated region body
PF: predicated region fallthrough
CT: control target
= control target key end

     0   :  { %8 = vsyncpa [#allocation3], 0  ;;  %s433_s0 = inlined_call_operand.hbm [shape: f32[4,32,128], index: 0, kind: input, shape index: {}]   ;;  %s434_s1 = inlined_call_operand.hbm [shape: f32[4,32,128], index: 1, kind: input, shape index: {}]   ;;  %s435_s2 = inlined_call_operand.hbm [shape: f32[32,128], index: 2, kind: input, shape index: {}]   ;;  %s436_s3 = inlined_call_operand.hbm [shape: f32[32,128], index: 3, kind: output, shape index: {}]  }
   0x1   :  { %9 = vsyncpa [#allocation6], 0 }
   0x2   :  { %10 = vsyncpa [#allocation4], 0  ;;  %s372_s12 = smov [#allocation5]   ;;  %s373_s14 = smov [#allocation2]  }
   0x3   :  { %s28_s13 = sshll.u32 %s372_s12, 4  ;;  %s16_s15 = sshll.u32 %s373_s14, 4  ;;  %s29_s13 = int_to_ptr.vmem [resolvable:$true] %s28_s13  ;;  %s17_s15 = int_to_ptr.vmem [resolvable:$true] %s16_s15 }
   0x4   :  { %s294_s16 = scalar_lea.vmem %s29_s13, 2048  ;;  %p299_p1 = scmp.lt.s32.totalorder %s29_s13, %s29_s13 }
   0x5   :  { %p295_p0 = scmp.ne.s32.totalorder %s29_s13, %s294_s16  ;;  %p300_p2 = scmp.lt.s32.totalorder %s294_s16, %s294_s16 }
   0x7   :  { %p301_p3 = por %p300_p2, %p299_p1 }
   0x9   :  { %p302_p4 = pnand %p301_p3, %p295_p0 }
   0xb   :  { %305 = shalt.err (!%p302_p4)
}
   0xc   :  { %s374_s17 = smov 128   ;;  %s375_s18 = smov 8  }
   0xd   :  { %34 = dma.hbm_to_vmem [thread:$0]  %s434_s1, 2048, %s29_s13, [#allocation6], %s374_s17, %s374_s17, %s375_s18  }
   0xe   :  { %s314_s21 = scalar_lea.vmem %s17_s15, 2048  ;;  %p319_p6 = scmp.lt.s32.totalorder %s17_s15, %s17_s15 }
   0xf   :  { %p315_p5 = scmp.ne.s32.totalorder %s17_s15, %s314_s21  ;;  %p320_p7 = scmp.lt.s32.totalorder %s314_s21, %s314_s21 }
  0x11   :  { %p321_p8 = por %p320_p7, %p319_p6 }
  0x13   :  { %p322_p9 = pnand %p321_p8, %p315_p5 }
  0x15   :  { %325 = shalt.err (!%p322_p9)
}
  0x16   :  { %22 = dma.hbm_to_vmem [thread:$0]  %s433_s0, 2048, %s17_s15, [#allocation3], %s374_s17, %s374_s17, %s375_s18  }
  0x17   :  { %s376_s24 = smov [#allocation7]  }
  0x18   :  { %s40_s25 = sshll.u32 %s376_s24, 4  ;;  %s41_s25 = int_to_ptr.vmem [resolvable:$true] %s40_s25 }
  0x19   :  { %s334_s26 = scalar_lea.vmem %s41_s25, 512  ;;  %p339_p11 = scmp.lt.s32.totalorder %s41_s25, %s41_s25 }
  0x1a   :  { %p335_p10 = scmp.ne.s32.totalorder %s41_s25, %s334_s26  ;;  %p340_p12 = scmp.lt.s32.totalorder %s334_s26, %s334_s26 }
  0x1c   :  { %p341_p13 = por %p340_p12, %p339_p11 }
  0x1e   :  { %p342_p0 = pnand %p341_p13, %p335_p10 }
  0x20   :  { %345 = shalt.err (!%p342_p0)
}
  0x21   :  { %46 = dma.hbm_to_vmem [thread:$0]  %s435_s2, 512, %s41_s25, [#allocation6], %s374_s17, %s374_s17, %s375_s18  }
  0x22   :  { %366 = dma.done.wait [#allocation3], 2048  }
  0x23   :  { %367 = vsyncadd [#allocation3], 4294965248 }
  0x24   :  { %368 = dma.done.wait [#allocation6], 2560  }
  0x25   :  { %369 = vsyncadd [#allocation6], 4294964736  ;;  %v56_v0 = vld [vmem:[#allocation2] sm:$0xff]  ;;  %v57_v21 = vld [vmem:[#allocation2 + $0x8] sm:$0xff]  ;;  %s377_s0 = smov [#allocation8]  }
  0x26   :  { %v61_v1 = vld [vmem:[#allocation2 + $0x20] sm:$0xff]  ;;  %v62_v22 = vld [vmem:[#allocation2 + $0x28] sm:$0xff]  ;;  %v58_v57 = vld [vmem:[#allocation2 + $0x10] sm:$0xff]  ;;  %s251_s2 = sshll.u32 %s377_s0, 4  ;;  %s252_s2 = int_to_ptr.vmem [resolvable:$true] %s251_s2 }
  0x27   :  { %v66_v2 = vld [vmem:[#allocation2 + $0x40] sm:$0xff]  ;;  %v67_v23 = vld [vmem:[#allocation2 + $0x48] sm:$0xff]  ;;  %v63_v62 = vld [vmem:[#allocation2 + $0x30] sm:$0xff]  ;;  %s346_s28 = scalar_lea.vmem %s252_s2, 512  ;;  %p351_p2 = scmp.lt.s32.totalorder %s252_s2, %s252_s2 }
  0x28   :  { %v71_v3 = vld [vmem:[#allocation2 + $0x60] sm:$0xff]  ;;  %v98_v6 = vsub.f32 %v66_v2, %v56_v0  ;;  %v72_v27 = vld [vmem:[#allocation2 + $0x68] sm:$0xff]  ;;  %v99_v30 = vsub.f32 %v67_v23, %v57_v21  ;;  %v68_v63 = vld [vmem:[#allocation2 + $0x50] sm:$0xff]  ;;  %p347_p1 = scmp.ne.s32.totalorder %s252_s2, %s346_s28  ;;  %p352_p3 = scmp.lt.s32.totalorder %s346_s28, %s346_s28 }
  0x29   :  { %v75_v4 = vld [vmem:[#allocation5] sm:$0xff]  ;;  %v102_v9 = vsub.f32 %v71_v3, %v61_v1  ;;  %v76_v28 = vld [vmem:[#allocation5 + $0x8] sm:$0xff]  ;;  %v103_v35 = vsub.f32 %v72_v27, %v62_v22 }
  0x2a   :  { %v80_v5 = vld [vmem:[#allocation5 + $0x20] sm:$0xff]  ;;  %v126_v10 = vmax.f32 %v56_v0, %v75_v4  ;;  %v182_v12 = vmin.f32 %v56_v0, %v75_v4  ;;  %v86_v29 = vld [vmem:[#allocation5 + $0x48] sm:$0xff]  ;;  %v127_v47 = vmax.f32 %v57_v21, %v76_v28  ;;  %v183_v52 = vmin.f32 %v57_v21, %v76_v28  ;;  %v73_v0 = vld [vmem:[#allocation2 + $0x70] sm:$0xff]  ;;  %p353_p4 = por %p352_p3, %p351_p2 }
  0x2b   :  { %v85_v7 = vld [vmem:[#allocation5 + $0x40] sm:$0xff]  ;;  %v142_v11 = vmax.f32 %v61_v1, %v80_v5  ;;  %v106_v17 = vmul.f32 %v102_v9, %v98_v6  ;;  %v198_v20 = vmin.f32 %v61_v1, %v80_v5  ;;  %v81_v33 = vld [vmem:[#allocation5 + $0x28] sm:$0xff]  ;;  %v111_v36 = vsub.f32 %v86_v29, %v76_v28  ;;  %v77_v9 = vld [vmem:[#allocation5 + $0x10] sm:$0xff] }
  0x2c   :  { %v90_v8 = vld [vmem:[#allocation5 + $0x60] sm:$0xff]  ;;  %v110_v13 = vsub.f32 %v85_v7, %v75_v4  ;;  %v122_v15 = vmin.f32 %v66_v2, %v85_v7  ;;  %v178_v18 = vmax.f32 %v66_v2, %v85_v7  ;;  %v91_v34 = vld [vmem:[#allocation5 + $0x68] sm:$0xff]  ;;  %v107_v43 = vmul.f32 %v103_v35, %v99_v30  ;;  %v59_v30 = vld [vmem:[#allocation2 + $0x18] sm:$0xff]  ;;  %p354_p5 = pnand %p353_p4, %p347_p1 }
  0x2d   :  { %v114_v14 = vsub.f32 %v90_v8, %v80_v5  ;;  %v138_v16 = vmin.f32 %v71_v3, %v90_v8  ;;  %v194_v19 = vmax.f32 %v71_v3, %v90_v8  ;;  %v115_v40 = vsub.f32 %v91_v34, %v81_v33  ;;  %v87_v3 = vld [vmem:[#allocation5 + $0x50] sm:$0xff]  ;;  %v64_v35 = vld [vmem:[#allocation2 + $0x38] sm:$0xff] }
  0x2e   :  { %v130_v25 = vsub.f32 %v122_v15, %v126_v10  ;;  %v186_v31 = vsub.f32 %v178_v18, %v182_v12  ;;  %v123_v44 = vmin.f32 %v67_v23, %v86_v29  ;;  %v139_v48 = vmin.f32 %v72_v27, %v91_v34  ;;  %v82_v10 = vld [vmem:[#allocation5 + $0x30] sm:$0xff] }
  0x2f   :  { %v118_v24 = vmul.f32 %v114_v14, %v110_v13  ;;  %v146_v26 = vsub.f32 %v138_v16, %v142_v11  ;;  %v202_v32 = vsub.f32 %v194_v19, %v198_v20  ;;  %v119_v46 = vmul.f32 %v115_v40, %v111_v36  ;;  %v92_v11 = vld [vmem:[#allocation5 + $0x70] sm:$0xff]  ;;  %v69_v36 = vld [vmem:[#allocation2 + $0x58] sm:$0xff] }
  0x30   :  { %v134_v37 = vmax.f32 %v130_v25, 0.0  ;;  %v190_v41 = vmax.f32 %v186_v31, 0.0  ;;  %v143_v50 = vmax.f32 %v62_v22, %v81_v33  ;;  %v179_v51 = vmax.f32 %v67_v23, %v86_v29  ;;  %v74_v40 = vld [vmem:[#allocation2 + $0x78] sm:$0xff] }
  0x31   :  { %v150_v38 = vmax.f32 %v146_v26, 0.0  ;;  %v158_v39 = vadd.f32 %v118_v24, %v106_v17  ;;  %v206_v42 = vmax.f32 %v202_v32, 0.0  ;;  %v131_v54 = vsub.f32 %v123_v44, %v127_v47  ;;  %v83_v47 = vld [vmem:[#allocation5 + $0x38] sm:$0xff] }
  0x32   :  { %v159_v55 = vadd.f32 %v119_v46, %v107_v43  ;;  %v195_v56 = vmax.f32 %v72_v27, %v91_v34  ;;  %v147_v59 = vsub.f32 %v139_v48, %v143_v50  ;;  %v187_v60 = vsub.f32 %v179_v51, %v183_v52  ;;  %v93_v48 = vld [vmem:[#allocation5 + $0x78] sm:$0xff] }
  0x33   :  { %v416_v45 = vmul.f32 %v150_v38, %v134_v37  ;;  %v210_v49 = vmul.f32 %v206_v42, %v190_v41  ;;  %v199_v61 = vmin.f32 %v62_v22, %v81_v33  ;;  %v135_v2 = vmax.f32 %v131_v54, 0.0  ;;  %v78_v41 = vld [vmem:[#allocation5 + $0x18] sm:$0xff] }
  0x34   :  { %v100_v4 = vsub.f32 %v68_v63, %v58_v57  ;;  %v104_v5 = vsub.f32 %v73_v0, %v63_v62  ;;  %v151_v6 = vmax.f32 %v147_v59, 0.0  ;;  %v191_v7 = vmax.f32 %v187_v60, 0.0  ;;  %v88_v42 = vld [vmem:[#allocation5 + $0x58] sm:$0xff] }
  0x35   :  { %v162_v53 = vsub.f32 %v158_v39, %v416_v45  ;;  %v214_v58 = vmax.f32 %v210_v49, 1e-06  ;;  %v203_v8 = vsub.f32 %v195_v56, %v199_v61  ;;  %v112_v13 = vsub.f32 %v87_v3, %v77_v9 }
  0x36   :  { %v108_v12 = vmul.f32 %v104_v5, %v100_v4  ;;  %v419_v14 = vmul.f32 %v151_v6, %v135_v2  ;;  %v116_v16 = vsub.f32 %v92_v11, %v82_v10  ;;  %v124_v17 = vmin.f32 %v68_v63, %v87_v3 }
  0x37   :  { %v166_v1 = vmax.f32 %v162_v53, 1e-06  ;;  %270 = vrcp.f32 %v214_v58  ;;  %v207_v15 = vmax.f32 %v203_v8, 0.0  ;;  %v128_v18 = vmax.f32 %v58_v57, %v77_v9 }
  0x38   :  { %v140_v19 = vmin.f32 %v73_v0, %v92_v11  ;;  %v144_v20 = vmax.f32 %v63_v62, %v82_v10  ;;  %v180_v21 = vmax.f32 %v68_v63, %v87_v3  ;;  %v163_v22 = vsub.f32 %v159_v55, %v419_v14 }
  0x39   :  { %272 = vrcp.f32 %v166_v1  ;;  %v422_v23 = vmul.f32 %v207_v15, %v191_v7  ;;  %v120_v24 = vmul.f32 %v116_v16, %v112_v13  ;;  %v184_v25 = vmin.f32 %v58_v57, %v77_v9 }
  0x3a   :  { %v132_v26 = vsub.f32 %v124_v17, %v128_v18  ;;  %v148_v27 = vsub.f32 %v140_v19, %v144_v20  ;;  %v196_v28 = vmax.f32 %v73_v0, %v92_v11  ;;  %v200_v29 = vmin.f32 %v63_v62, %v82_v10  ;;  %v94_v17 = vld [vmem:[#allocation7] sm:$0xff] }
  0x3b   :  { %v167_v31 = vmax.f32 %v163_v22, 1e-06  ;;  %v215_v32 = vmax.f32 %v422_v23, 1e-06  ;;  %v160_v33 = vadd.f32 %v120_v24, %v108_v12  ;;  %v188_v34 = vsub.f32 %v180_v21, %v184_v25 }
  0x3c   :  { %v136_v37 = vmax.f32 %v132_v26, 0.0  ;;  %v152_v38 = vmax.f32 %v148_v27, 0.0  ;;  %v204_v39 = vsub.f32 %v196_v28, %v200_v29  ;;  %v101_v43 = vsub.f32 %v69_v36, %v59_v30 }
  0x3d   :  { %v218_v44 = vsub.f32 %v214_v58, %v166_v1  ;;  %274 = vrcp.f32 %v167_v31  ;;  %v192_v46 = vmax.f32 %v188_v34, 0.0  ;;  %v105_v49 = vsub.f32 %v74_v40, %v64_v35  ;;  %v95_v34 = vld [vmem:[#allocation7 + $0x8] sm:$0xff] }
  0x3e   :  { %276 = vrcp.f32 %v215_v32  ;;  %v156_v50 = vmul.f32 %v152_v38, %v136_v37  ;;  %v208_v51 = vmax.f32 %v204_v39, 0.0  ;;  %v113_v52 = vsub.f32 %v88_v42, %v78_v41 }
  0x3f   :  { %v109_v53 = vmul.f32 %v105_v49, %v101_v43  ;;  %v117_v54 = vsub.f32 %v93_v48, %v83_v47  ;;  %v125_v55 = vmin.f32 %v69_v36, %v88_v42  ;;  %v129_v56 = vmax.f32 %v59_v30, %v78_v41 }
  0x40   :  { %v164_v57 = vsub.f32 %v160_v33, %v156_v50  ;;  %v212_v59 = vmul.f32 %v208_v51, %v192_v46  ;;  %v141_v60 = vmin.f32 %v74_v40, %v93_v48  ;;  %v145_v61 = vmax.f32 %v64_v35, %v83_v47  ;;  %v97_v51 = vld [vmem:[#allocation7 + $0x18] sm:$0xff] }
  0x41   :  { %v121_v62 = vmul.f32 %v117_v54, %v113_v52  ;;  %v133_v63 = vsub.f32 %v125_v55, %v129_v56  ;;  %v181_v58 = vmax.f32 %v69_v36, %v88_v42  ;;  %v185_v0 = vmin.f32 %v59_v30, %v78_v41  ;;  %v96_v41 = vld [vmem:[#allocation7 + $0x10] sm:$0xff] }
  0x42   :  { %v168_v2 = vmax.f32 %v164_v57, 1e-06  ;;  %v216_v3 = vmax.f32 %v212_v59, 1e-06  ;;  %v149_v4 = vsub.f32 %v141_v60, %v145_v61  ;;  %v197_v9 = vmax.f32 %v74_v40, %v93_v48 }
  0x43   :  { %v137_v7 = vmax.f32 %v133_v63, 0.0  ;;  %v189_v8 = vsub.f32 %v181_v58, %v185_v0  ;;  %v161_v12 = vadd.f32 %v121_v62, %v109_v53  ;;  %v201_v13 = vmin.f32 %v64_v35, %v83_v47 }
  0x44   :  { %v271_v1 = vpop.eup %270  ;;  %278 = vrcp.f32 %v168_v2  ;;  %v153_v11 = vmax.f32 %v149_v4, 0.0  ;;  %v219_v21 = vsub.f32 %v215_v32, %v167_v31  ;;  %v220_v35 = vsub.f32 %v216_v3, %v168_v2 }
  0x45   :  { %v223_v6 = vmul.f32 %v271_v1, %v218_v44  ;;  %280 = vrcp.f32 %v216_v3  ;;  %v193_v18 = vmax.f32 %v189_v8, 0.0  ;;  %v205_v19 = vsub.f32 %v197_v9, %v201_v13 }
  0x46   :  { %v273_v5 = vpop.eup %272  ;;  %v157_v16 = vmul.f32 %v153_v11, %v137_v7 }
  0x47   :  { %v171_v10 = vmul.f32 %v273_v5, %v416_v45  ;;  %v209_v23 = vmax.f32 %v205_v19, 0.0 }
  0x48   :  { %v165_v22 = vsub.f32 %v161_v12, %v157_v16 }
  0x49   :  { %v230_v15 = vsub.f32 %v171_v10, %v223_v6  ;;  %v213_v28 = vmul.f32 %v209_v23, %v193_v18 }
  0x4a   :  { %v275_v24 = vpop.eup %274  ;;  %v169_v26 = vmax.f32 %v165_v22, 1e-06 }
  0x4b   :  { %v234_v20 = vsub.f32 1.0, %v230_v15  ;;  %v277_v27 = vpop.eup %276  ;;  %v173_v45 = vmul.f32 %v275_v24, %v419_v14  ;;  %v217_v30 = vmax.f32 %v213_v28, 1e-06 }
  0x4c   :  { %v225_v29 = vmul.f32 %v277_v27, %v219_v21  ;;  %282 = vrcp.f32 %v169_v26 }
  0x4d   :  { %v238_v25 = vmul.f32 %v234_v20, %v94_v17  ;;  %284 = vrcp.f32 %v217_v30  ;;  %v221_v44 = vsub.f32 %v217_v30, %v169_v26 }
  0x4e   :  { %v231_v33 = vsub.f32 %v173_v45, %v225_v29 }
  0x4f   :  { %242 = vst [vmem:[#allocation8] sm:$0xff] %v238_v25 }
  0x50   :  { %v235_v36 = vsub.f32 1.0, %v231_v33 }
  0x51   :  { %v279_v37 = vpop.eup %278 }
  0x52   :  { %v281_v31 = vpop.eup %280  ;;  %v239_v32 = vmul.f32 %v235_v36, %v95_v34  ;;  %v175_v38 = vmul.f32 %v279_v37, %v156_v50 }
  0x53   :  { %v227_v39 = vmul.f32 %v281_v31, %v220_v35 }
  0x54   :  { %243 = vst [vmem:[#allocation8 + $0x8] sm:$0xff] %v239_v32 }
  0x55   :  { %v232_v40 = vsub.f32 %v175_v38, %v227_v39 }
  0x57   :  { %v236_v42 = vsub.f32 1.0, %v232_v40 }
  0x59   :  { %v283_v14 = vpop.eup %282  ;;  %v240_v43 = vmul.f32 %v236_v42, %v96_v41 }
  0x5a   :  { %v177_v46 = vmul.f32 %v283_v14, %v157_v16  ;;  %v285_v47 = vpop.eup %284 }
  0x5b   :  { %244 = vst [vmem:[#allocation8 + $0x10] sm:$0xff] %v240_v43  ;;  %v229_v48 = vmul.f32 %v285_v47, %v221_v44 }
  0x5d   :  { %v233_v49 = vsub.f32 %v177_v46, %v229_v48 }
  0x5f   :  { %v237_v52 = vsub.f32 1.0, %v233_v49 }
  0x61   :  { %v241_v53 = vmul.f32 %v237_v52, %v97_v51 }
  0x63   :  { %245 = vst [vmem:[#allocation8 + $0x18] sm:$0xff] %v241_v53 }
  0x64   :  { %357 = shalt.err (!%p354_p5)
}
  0x65   :  { %257 = dma.vmem_to_hbm [thread:$0]  %s252_s2, 512, %s436_s3, [#allocation4], %s374_s17, %s374_s17, %s375_s18  }
  0x66   :  { %370 = dma.done.wait [#allocation4], 512  }
  0x67   :  { %371 = vsyncadd [#allocation4], 4294966784 }
  0x68   :  { %261 = vsyncpa [#allocation3], 1 }
  0x69   :  { %262 = vsyncpa [#allocation6], 1 }
  0x6a   :  { %263 = vsyncpa [#allocation4], 1 }

</bundles_post_ra>
